<compile_context>
chip_gen: v7x
topology: tpu7x:2x2x1
jax: 0.10.0
libtpu: 0.0.40
codegen_flags: <defaults>
</compile_context>

<pallas_src>
import functools

import jax
import jax.numpy as jnp
from jax.experimental import pallas as pl
from jax.experimental.pallas import tpu as pltpu

INPUT_SIZE = 14
HIDDEN_LAYERS = (32, 32, 32)   # hidden_layers from config (small, synthetic)
LEN_OUTPUT = 6                 # final Linear(H3 -> lenoutput) is removed by
                               # FeatureExtractor, so it is never materialized.

DEFAULT_TILE_B = 512           # batch lanes per grid step (multiple of 128)


def _round_up(n, m):
    return ((n + m - 1) // m) * m


def _feature_extractor_kernel(x_ref,
                              w1_ref, b1_ref,
                              w2_ref, b2_ref,
                              w3_ref, b3_ref,
                              o_ref):
    """Fused 3x(Linear+ReLU) on a feature-major (F, TILE_B) batch tile.

    Weights are (out, in) (PyTorch layout), biases are (out, 1), x is (in, B),
    so each layer is h = relu(W @ x + b) with batch on the lane axis.
    Dropout p = 0.0 (eval mode) -> identity, so it is omitted.
    """
    cdt = x_ref.dtype  # compute dtype for MXU inputs (bf16 or f32)

    h = jnp.dot(w1_ref[...], x_ref[...], preferred_element_type=jnp.float32)
    h = jnp.maximum(h + b1_ref[...], 0.0).astype(cdt)

    h = jnp.dot(w2_ref[...], h, preferred_element_type=jnp.float32)
    h = jnp.maximum(h + b2_ref[...], 0.0).astype(cdt)

    h = jnp.dot(w3_ref[...], h, preferred_element_type=jnp.float32)
    h = jnp.maximum(h + b3_ref[...], 0.0)

    o_ref[...] = h.astype(o_ref.dtype)


@functools.partial(jax.jit, static_argnames=("tile_b", "compute_dtype"))
def feature_extractor(x, params, *, tile_b=DEFAULT_TILE_B,
                      compute_dtype=jnp.bfloat16):
    """x: (B, 14) float32.  Returns (B, HIDDEN_LAYERS[-1]) float32 features."""
    (w1, b1), (w2, b2), (w3, b3) = params
    B = x.shape[0]
    H3 = w3.shape[0]

    # Feature-major: batch on the 128-lane axis, features on sublanes.
    xt = x.T.astype(compute_dtype)                      # (F_in, B)
    tb = min(tile_b, _round_up(B, 128))                 # lane-aligned tile
    Bp = _round_up(B, tb)                               # pad so tiles divide B
    if Bp != B:
        xt = jnp.pad(xt, ((0, 0), (0, Bp - B)))         # zero cols -> relu(b), sliced off

    def wcast(w):
        return w.astype(compute_dtype)

    def bcol(b):
        return b.reshape(-1, 1).astype(jnp.float32)     # (out, 1), f32 bias add

    grid = (Bp // tb,)
    x_spec = pl.BlockSpec((INPUT_SIZE, tb), lambda i: (0, i))
    out_spec = pl.BlockSpec((H3, tb), lambda i: (0, i))
    # Weights/biases: whole array, constant block index -> stays VMEM-resident,
    # never re-fetched across grid steps.
    resident = lambda shape: pl.BlockSpec(shape, lambda i: (0, 0))

    out_fm = pl.pallas_call(
        _feature_extractor_kernel,
        out_shape=jax.ShapeDtypeStruct((H3, Bp), jnp.float32),
        grid=grid,
        in_specs=[x_spec,
                  resident(w1.shape), resident((w1.shape[0], 1)),
                  resident(w2.shape), resident((w2.shape[0], 1)),
                  resident(w3.shape), resident((w3.shape[0], 1))],
        out_specs=out_spec,
        compiler_params=pltpu.CompilerParams(
            dimension_semantics=("parallel",)),   # megacore split on v7x
    )(xt, wcast(w1), bcol(b1), wcast(w2), bcol(b2), wcast(w3), bcol(b3))

    return out_fm[:, :B].T                               # (B, H3) float32


def init_params(key):
    """Deterministic synthetic init of the pretrained MLP (PyTorch layout).

    W is (out_features, in_features), b is (out_features,), matching
    nn.Linear; the kernel computes W @ x + b on feature-major activations.
    """
    dims = (INPUT_SIZE,) + HIDDEN_LAYERS
    params = []
    for i, (d_in, d_out) in enumerate(zip(dims[:-1], dims[1:])):
        kw, kb = jax.random.split(jax.random.fold_in(key, i))
        bound = 1.0 / (d_in ** 0.5)                      # PyTorch Linear default
        w = jax.random.uniform(kw, (d_out, d_in), jnp.float32, -bound, bound)
        b = jax.random.uniform(kb, (d_out,), jnp.float32, -bound, bound)
        params.append((w, b))
    return params


def _reference(x, params):
    """Pure-JAX f32 reference of the FeatureExtractor forward pass."""
    h = x
    for w, b in params:
        h = jnp.maximum(h @ w.T + b, 0.0)
    return h


if __name__ == "__main__":
    key = jax.random.PRNGKey(0)
    kx, kp = jax.random.split(key)
    params = init_params(kp)

    # TODO(synk): dropout is only implemented as the p=0.0 / eval-mode identity
    # (the reference config uses dropout=0.0); stochastic training-mode dropout
    # would need pltpu.prng_* inside the kernel.

    # 1) Small batch, exact f32 path (tight tolerance).
    B = 8
    x = jax.random.normal(jax.random.fold_in(kx, B), (B, INPUT_SIZE), jnp.float32)
    out = jax.block_until_ready(
        feature_extractor(x, params, compute_dtype=jnp.float32))
    ref = _reference(x, params)
    assert out.shape == (B, HIDDEN_LAYERS[-1]), out.shape
    assert jnp.allclose(out, ref, atol=1e-5, rtol=1e-5), \
        float(jnp.max(jnp.abs(out - ref)))

    # 2) Ragged multi-tile batch, bf16 fast path (looser tolerance).
    B = 1037
    x = jax.random.normal(jax.random.fold_in(kx, B), (B, INPUT_SIZE), jnp.float32)
    out = jax.block_until_ready(
        feature_extractor(x, params, compute_dtype=jnp.bfloat16))
    ref = _reference(x, params)
    assert out.shape == (B, HIDDEN_LAYERS[-1]), out.shape
    assert jnp.allclose(out, ref, atol=5e-2, rtol=5e-2), \
        float(jnp.max(jnp.abs(out - ref)))

    print("KERNEL_OK")
</pallas_src>

<mosaic_0001>
module attributes {stable_mosaic.version = 11 : i64} {
  func.func @_feature_extractor_kernel(%arg0: i32, %arg1: memref<14x128xf32, #tpu.memory_space<vmem>>, %arg2: memref<32x14xf32, #tpu.memory_space<vmem>>, %arg3: memref<32x1xf32, #tpu.memory_space<vmem>>, %arg4: memref<32x32xf32, #tpu.memory_space<vmem>>, %arg5: memref<32x1xf32, #tpu.memory_space<vmem>>, %arg6: memref<32x32xf32, #tpu.memory_space<vmem>>, %arg7: memref<32x1xf32, #tpu.memory_space<vmem>>, %arg8: memref<32x128xf32, #tpu.memory_space<vmem>>) attributes {dimension_semantics = [#tpu.dimension_semantics<parallel>], iteration_bounds = array<i64: 1>, scalar_prefetch = 0 : i64, scratch_operands = 0 : i64, tpu.core_type = #tpu.core_type<tc>, window_params = [{transform_indices = @transform_0, window_bounds = array<i64: 14, 128>}, {pipeline_mode = #tpu.pipeline_mode<synchronous>, transform_indices = @transform_1, window_bounds = array<i64: 32, 14>}, {pipeline_mode = #tpu.pipeline_mode<synchronous>, transform_indices = @transform_2, window_bounds = array<i64: 32, 1>}, {pipeline_mode = #tpu.pipeline_mode<synchronous>, transform_indices = @transform_3, window_bounds = array<i64: 32, 32>}, {pipeline_mode = #tpu.pipeline_mode<synchronous>, transform_indices = @transform_4, window_bounds = array<i64: 32, 1>}, {pipeline_mode = #tpu.pipeline_mode<synchronous>, transform_indices = @transform_5, window_bounds = array<i64: 32, 32>}, {pipeline_mode = #tpu.pipeline_mode<synchronous>, transform_indices = @transform_6, window_bounds = array<i64: 32, 1>}, {transform_indices = @transform_7, window_bounds = array<i64: 32, 128>}]} {
    %c0 = arith.constant 0 : index
    %c0_0 = arith.constant 0 : index
    %0 = vector.load %arg2[%c0, %c0_0] : memref<32x14xf32, #tpu.memory_space<vmem>>, vector<32x14xf32>
    %c0_1 = arith.constant 0 : index
    %c0_2 = arith.constant 0 : index
    %1 = vector.load %arg1[%c0_1, %c0_2] : memref<14x128xf32, #tpu.memory_space<vmem>>, vector<14x128xf32>
    %cst = arith.constant dense<0.000000e+00> : vector<32x128xf32>
    %2 = tpu.matmul %0, %1, %cst {dimension_numbers = #tpu.dot_dimension_numbers<[1], [0], [0], [1], [0, 0, 1, 1], [], []>} : vector<32x14xf32>, vector<14x128xf32>, vector<32x128xf32> -> vector<32x128xf32>
    %c0_3 = arith.constant 0 : index
    %c0_4 = arith.constant 0 : index
    %3 = vector.load %arg3[%c0_3, %c0_4] : memref<32x1xf32, #tpu.memory_space<vmem>>, vector<32x1xf32>
    %4 = vector.broadcast %3 : vector<32x1xf32> to vector<32x128xf32>
    %5 = arith.addf %2, %4 : vector<32x128xf32>
    %cst_5 = arith.constant 0.000000e+00 : f32
    %6 = vector.broadcast %cst_5 : f32 to vector<32x128xf32>
    %7 = arith.maximumf %5, %6 : vector<32x128xf32>
    %c0_6 = arith.constant 0 : index
    %c0_7 = arith.constant 0 : index
    %8 = vector.load %arg4[%c0_6, %c0_7] : memref<32x32xf32, #tpu.memory_space<vmem>>, vector<32x32xf32>
    %cst_8 = arith.constant dense<0.000000e+00> : vector<32x128xf32>
    %9 = tpu.matmul %8, %7, %cst_8 {dimension_numbers = #tpu.dot_dimension_numbers<[1], [0], [0], [1], [0, 0, 1, 1], [], []>} : vector<32x32xf32>, vector<32x128xf32>, vector<32x128xf32> -> vector<32x128xf32>
    %c0_9 = arith.constant 0 : index
    %c0_10 = arith.constant 0 : index
    %10 = vector.load %arg5[%c0_9, %c0_10] : memref<32x1xf32, #tpu.memory_space<vmem>>, vector<32x1xf32>
    %11 = vector.broadcast %10 : vector<32x1xf32> to vector<32x128xf32>
    %12 = arith.addf %9, %11 : vector<32x128xf32>
    %cst_11 = arith.constant 0.000000e+00 : f32
    %13 = vector.broadcast %cst_11 : f32 to vector<32x128xf32>
    %14 = arith.maximumf %12, %13 : vector<32x128xf32>
    %c0_12 = arith.constant 0 : index
    %c0_13 = arith.constant 0 : index
    %15 = vector.load %arg6[%c0_12, %c0_13] : memref<32x32xf32, #tpu.memory_space<vmem>>, vector<32x32xf32>
    %cst_14 = arith.constant dense<0.000000e+00> : vector<32x128xf32>
    %16 = tpu.matmul %15, %14, %cst_14 {dimension_numbers = #tpu.dot_dimension_numbers<[1], [0], [0], [1], [0, 0, 1, 1], [], []>} : vector<32x32xf32>, vector<32x128xf32>, vector<32x128xf32> -> vector<32x128xf32>
    %c0_15 = arith.constant 0 : index
    %c0_16 = arith.constant 0 : index
    %17 = vector.load %arg7[%c0_15, %c0_16] : memref<32x1xf32, #tpu.memory_space<vmem>>, vector<32x1xf32>
    %18 = vector.broadcast %17 : vector<32x1xf32> to vector<32x128xf32>
    %19 = arith.addf %16, %18 : vector<32x128xf32>
    %cst_17 = arith.constant 0.000000e+00 : f32
    %20 = vector.broadcast %cst_17 : f32 to vector<32x128xf32>
    %21 = arith.maximumf %19, %20 : vector<32x128xf32>
    %c0_18 = arith.constant 0 : index
    %c0_19 = arith.constant 0 : index
    %22 = vector.load %arg8[%c0_18, %c0_19] : memref<32x128xf32, #tpu.memory_space<vmem>>, vector<32x128xf32>
    tpu.vector_store %arg8[%c0_18, %c0_19], %21 {strides = array<i32>} : memref<32x128xf32, #tpu.memory_space<vmem>>, vector<32x128xf32>,
    return
  }
  func.func @transform_0(%arg0: i32) -> (i32, i32) {
    %c0_i32 = arith.constant 0 : i32
    %c0_i32_0 = arith.constant 0 : i32
    return %c0_i32, %arg0 : i32, i32
  }
  func.func @transform_1(%arg0: i32) -> (i32, i32) {
    %c0_i32 = arith.constant 0 : i32
    %c0_i32_0 = arith.constant 0 : i32
    %c0_i32_1 = arith.constant 0 : i32
    return %c0_i32, %c0_i32_0 : i32, i32
  }
  func.func @transform_2(%arg0: i32) -> (i32, i32) {
    %c0_i32 = arith.constant 0 : i32
    %c0_i32_0 = arith.constant 0 : i32
    %c0_i32_1 = arith.constant 0 : i32
    return %c0_i32, %c0_i32_0 : i32, i32
  }
  func.func @transform_3(%arg0: i32) -> (i32, i32) {
    %c0_i32 = arith.constant 0 : i32
    %c0_i32_0 = arith.constant 0 : i32
    %c0_i32_1 = arith.constant 0 : i32
    return %c0_i32, %c0_i32_0 : i32, i32
  }
  func.func @transform_4(%arg0: i32) -> (i32, i32) {
    %c0_i32 = arith.constant 0 : i32
    %c0_i32_0 = arith.constant 0 : i32
    %c0_i32_1 = arith.constant 0 : i32
    return %c0_i32, %c0_i32_0 : i32, i32
  }
  func.func @transform_5(%arg0: i32) -> (i32, i32) {
    %c0_i32 = arith.constant 0 : i32
    %c0_i32_0 = arith.constant 0 : i32
    %c0_i32_1 = arith.constant 0 : i32
    return %c0_i32, %c0_i32_0 : i32, i32
  }
  func.func @transform_6(%arg0: i32) -> (i32, i32) {
    %c0_i32 = arith.constant 0 : i32
    %c0_i32_0 = arith.constant 0 : i32
    %c0_i32_1 = arith.constant 0 : i32
    return %c0_i32, %c0_i32_0 : i32, i32
  }
  func.func @transform_7(%arg0: i32) -> (i32, i32) {
    %c0_i32 = arith.constant 0 : i32
    %c0_i32_0 = arith.constant 0 : i32
    return %c0_i32, %arg0 : i32, i32
  }
}

</mosaic_0001>

<bundles_post_ra>
// kernel: feature_extractor.1
= control target key start
LH: loop header
LB: loop body
LE: loop exit
PB: predicated region body
PF: predicated region fallthrough
CT: control target
= control target key end

     0   :  { %vm69_vm0 = vcmask 1045504   ;;  %vm56_vm1 = vcmask 113664   ;;  %vm528_vm2 = vmmov 1   ;;  %v529_v2 = vmov 0   ;;  %s672_s0 = inlined_call_operand.vmem [shape: f32[14,128], index: 0, kind: input, shape index: {}]   ;;  %s673_s1 = inlined_call_operand.vmem [shape: f32[32,14], index: 1, kind: input, shape index: {}]   ;;  %s674_s2 = inlined_call_operand.vmem [shape: f32[32,1], index: 2, kind: input, shape index: {}]   ;;  %s675_s4 = inlined_call_operand.vmem [shape: f32[32,1], index: 4, kind: input, shape index: {}]   ;;  %s676_s6 = inlined_call_operand.vmem [shape: f32[32,1], index: 6, kind: input, shape index: {}]   ;;  %s677_s3 = inlined_call_operand.vmem [shape: f32[32,32], index: 3, kind: input, shape index: {}]   ;;  %s678_s5 = inlined_call_operand.vmem [shape: f32[32,32], index: 5, kind: input, shape index: {}]   ;;  %s679_s7 = inlined_call_operand.vmem [shape: f32[32,128], index: 7, kind: output, shape index: {}]  }
   0x1   :  { %v30_v0 = vld [vmem:[%s672_s0] sm:$0xff]  ;;  %v31_v1 = vld [vmem:[%s672_s0 + $0x8] sm:$0x3f]  ;;  %vm503_vm3 = vmpackc.low %vm69_vm0, %vm528_vm2  ;;  %526 = vset.pattern.permute.xlu0 %v529_v2  ;;  %527 = vset.pattern.permute.xlu1 %v529_v2  ;;  %vm190_vm4 = vcmask 261120  }
   0x2   :  { %v502_v3 = vpack.c.bf16 %v31_v1, %v30_v0  ;;  %v26_v4 = vld [vmem:[%s673_s1] sm:$0xff]  ;;  %v34_v6 = vld [vmem:[%s674_s2 + $0x10] sm:$0xff]  ;;  %v27_v7 = vld [vmem:[%s673_s1 + $0x8] sm:$0xff] }
   0x3   :  { %468 = vmatprep.mubr.msk.f32.mxu0 %vm56_vm1, %v26_v4  ;;  %v32_v5 = vld [vmem:[%s674_s2] sm:$0xff]  ;;  %48 = vperm.xlu1 %527, %v34_v6   ;;  %v33_v8 = vld [vmem:[%s674_s2 + $0x8] sm:$0xff]  ;;  %v28_v9 = vld [vmem:[%s673_s1 + $0x10] sm:$0xff] }
   0x4   :  { %504 = vmatprep.subr.msk.bf16.mxu0 %vm503_vm3, %v502_v3  ;;  %38 = vperm.xlu0 %526, %v32_v5   ;;  %v35_v10 = vld [vmem:[%s674_s2 + $0x18] sm:$0xff]  ;;  %v166_v12 = vld [vmem:[%s675_s4] sm:$0xff]  ;;  %v167_v13 = vld [vmem:[%s675_s4 + $0x8] sm:$0xff] }
   0x5   :  { %507 = vmatpush3.bf16.msk.msra.mxu0 %vm503_vm3, %v502_v3  ;;  %v29_v11 = vld [vmem:[%s673_s1 + $0x18] sm:$0xff]  ;;  %v168_v14 = vld [vmem:[%s675_s4 + $0x10] sm:$0xff]  ;;  %v296_v16 = vld [vmem:[%s676_s6] sm:$0xff] }
   0x6   :  { %v169_v15 = vld [vmem:[%s675_s4 + $0x18] sm:$0xff]  ;;  %v297_v17 = vld [vmem:[%s676_s6 + $0x8] sm:$0xff]  ;;  %v298_v18 = vld [vmem:[%s676_s6 + $0x10] sm:$0xff] }
   0x7   :  { %53 = vperm.xlu1 %527, %v35_v10   ;;  %v299_v19 = vld [vmem:[%s676_s6 + $0x18] sm:$0xff]  ;;  %v162_v20 = vld [vmem:[%s677_s3] sm:$0xff]  ;;  %v163_v39 = vld [vmem:[%s677_s3 + $0x8] sm:$0xff] }
   0x8   :  { %469 = vmatmul.mubr.msk.f32.vlgmr.msra.gmra.mrb[0].mxu0 %vm56_vm1, %v27_v7  ;;  %43 = vperm.xlu0 %526, %v33_v8   ;;  %v164_v40 = vld [vmem:[%s677_s3 + $0x10] sm:$0xff]  ;;  %v165_v41 = vld [vmem:[%s677_s3 + $0x18] sm:$0xff]  ;;  %v292_v42 = vld [vmem:[%s678_s5] sm:$0xff] }
   0x9   :  { %471 = vmatprep.mubr.msk.f32.mxu0 %vm56_vm1, %v28_v9  ;;  %482 = vmatprep.mubr.msk.f32.mxu1 %vm190_vm4, %v162_v20  ;;  %v293_v61 = vld [vmem:[%s678_s5 + $0x8] sm:$0xff]  ;;  %v294_v62 = vld [vmem:[%s678_s5 + $0x10] sm:$0xff]  ;;  %v295_v63 = vld [vmem:[%s678_s5 + $0x18] sm:$0xff] }
   0xb   :  { %177 = vperm.xlu1 %527, %v167_v13  }
   0xc   :  { %472 = vmatmul.mubr.msk.f32.gmra.mrb[2].mxu0 %vm56_vm1, %v29_v11  ;;  %172 = vperm.xlu0 %526, %v166_v12  }
   0xd   :  { %496 = vmatprep.mubr.msk.f32.mxu0 %vm190_vm4, %v292_v42 }
   0xf   :  { %187 = vperm.xlu1 %527, %v169_v15  }
  0x10   :  { %182 = vperm.xlu0 %526, %v168_v14  }
  0x13   :  { %307 = vperm.xlu1 %527, %v297_v17  }
  0x14   :  { %302 = vperm.xlu0 %526, %v296_v16  }
  0x17   :  { %317 = vperm.xlu1 %527, %v299_v19  }
  0x18   :  { %312 = vperm.xlu0 %526, %v298_v18  }
  0x82   :  { %v49_v22 = vpop.permute.xlu1 %48 }
  0x83   :  { %v39_v21 = vpop.permute.xlu0 %38 }
  0x86   :  { %v54_v29 = vpop.permute.xlu1 %53 }
  0x87   :  { %v44_v23 = vpop.permute.xlu0 %43 }
  0x8a   :  { %v178_v43 = vpop.permute.xlu1 %177 }
  0x8b   :  { %v173_v44 = vpop.permute.xlu0 %172 }
  0x8e   :  { %v188_v50 = vpop.permute.xlu1 %187 }
  0x8f   :  { %v183_v53 = vpop.permute.xlu0 %182 }
  0x92   :  { %v308_v0 = vpop.permute.xlu1 %307 }
  0x93   :  { %v303_v1 = vpop.permute.xlu0 %302 }
  0x96   :  { %v318_v7 = vpop.permute.xlu1 %317 }
  0x97   :  { %v313_v10 = vpop.permute.xlu0 %312 }
  0xdb   :  { %v470_v24 = vpop.f32.mrb[0].mxu0 }
  0xdc   :  { %v145_v25 = vadd.f32 %v470_v24, %v44_v23  ;;  %v139_v26 = vpop.f32.mrb[1].mxu0 }
  0xdd   :  { %v140_v27 = vadd.f32 %v139_v26, %v39_v21 }
  0xde   :  { %v159_v28 = vmax.f32 %v145_v25, 0.0 }
  0xdf   :  { %v158_v30 = vmax.f32 %v140_v27, 0.0  ;;  %v473_v31 = vpop.f32.mrb[2].mxu0 }
  0xe0   :  { %v155_v32 = vadd.f32 %v473_v31, %v54_v29  ;;  %v149_v33 = vpop.f32.mrb[3].mxu0 }
  0xe1   :  { %v150_v34 = vadd.f32 %v149_v33, %v49_v22  ;;  %v508_v35 = vpack.c.bf16 %v159_v28, %v158_v30 }
  0xe2   :  { %v161_v36 = vmax.f32 %v155_v32, 0.0 }
  0xe3   :  { %v160_v37 = vmax.f32 %v150_v34, 0.0  ;;  %509 = vmatprep.subr.bf16.mxu1 %v508_v35 }
  0xe4   :  { %511 = vmatpush3.bf16.msra.mxu1 %v508_v35 }
  0xe5   :  { %v512_v38 = vpack.c.bf16 %v161_v36, %v160_v37 }
  0xe7   :  { %513 = vmatprep.subr.bf16.mxu1 %v512_v38 }
  0xe8   :  { %515 = vmatpush3.bf16.msra.mxu1 %v512_v38 }
  0xeb   :  { %483 = vmatmul.mubr.msk.f32.vlgmr.msra.gmra.mrb[0].mxu1 %vm190_vm4, %v163_v39 }
  0xec   :  { %485 = vmatprep.mubr.msk.f32.mxu1 %vm190_vm4, %v164_v40 }
  0xef   :  { %486 = vmatmul.mubr.msk.f32.gmra.mrb[2].mxu1 %vm190_vm4, %v165_v41 }
 0x1be   :  { %v484_v45 = vpop.f32.mrb[0].mxu1 }
 0x1bf   :  { %v275_v46 = vadd.f32 %v484_v45, %v178_v43  ;;  %v269_v47 = vpop.f32.mrb[1].mxu1 }
 0x1c0   :  { %v270_v48 = vadd.f32 %v269_v47, %v173_v44 }
 0x1c1   :  { %v289_v49 = vmax.f32 %v275_v46, 0.0 }
 0x1c2   :  { %v288_v51 = vmax.f32 %v270_v48, 0.0  ;;  %v487_v52 = vpop.f32.mrb[2].mxu1 }
 0x1c3   :  { %v285_v54 = vadd.f32 %v487_v52, %v188_v50  ;;  %v279_v55 = vpop.f32.mrb[3].mxu1 }
 0x1c4   :  { %v516_v56 = vpack.c.bf16 %v289_v49, %v288_v51  ;;  %v280_v57 = vadd.f32 %v279_v55, %v183_v53 }
 0x1c5   :  { %v291_v58 = vmax.f32 %v285_v54, 0.0 }
 0x1c6   :  { %v290_v59 = vmax.f32 %v280_v57, 0.0  ;;  %517 = vmatprep.subr.bf16.mxu0 %v516_v56 }
 0x1c7   :  { %519 = vmatpush3.bf16.msra.mxu0 %v516_v56 }
 0x1c8   :  { %v520_v60 = vpack.c.bf16 %v291_v58, %v290_v59 }
 0x1ca   :  { %521 = vmatprep.subr.bf16.mxu0 %v520_v60 }
 0x1cb   :  { %523 = vmatpush3.bf16.msra.mxu0 %v520_v60 }
 0x1ce   :  { %497 = vmatmul.mubr.msk.f32.vlgmr.msra.gmra.mrb[4].mxu0 %vm190_vm4, %v293_v61 }
 0x1cf   :  { %499 = vmatprep.mubr.msk.f32.mxu0 %vm190_vm4, %v294_v62 }
 0x1d2   :  { %500 = vmatmul.mubr.msk.f32.gmra.mrb[6].mxu0 %vm190_vm4, %v295_v63 }
 0x2a1   :  { %v498_v2 = vpop.f32.mrb[4].mxu0 }
 0x2a2   :  { %v404_v3 = vadd.f32 %v498_v2, %v308_v0  ;;  %v398_v4 = vpop.f32.mrb[5].mxu0 }
 0x2a3   :  { %v399_v5 = vadd.f32 %v398_v4, %v303_v1 }
 0x2a4   :  { %v418_v6 = vmax.f32 %v404_v3, 0.0 }
 0x2a5   :  { %v417_v8 = vmax.f32 %v399_v5, 0.0  ;;  %v501_v9 = vpop.f32.mrb[6].mxu0 }
 0x2a6   :  { %422 = vst [vmem:[%s679_s7 + $0x8] sm:$0xff] %v418_v6  ;;  %v414_v11 = vadd.f32 %v501_v9, %v318_v7  ;;  %v408_v12 = vpop.f32.mrb[7].mxu0 }
 0x2a7   :  { %421 = vst [vmem:[%s679_s7] sm:$0xff] %v417_v8  ;;  %v409_v13 = vadd.f32 %v408_v12, %v313_v10 }
 0x2a8   :  { %v420_v14 = vmax.f32 %v414_v11, 0.0 }
 0x2a9   :  { %v419_v15 = vmax.f32 %v409_v13, 0.0 }
 0x2aa   :  { %424 = vst [vmem:[%s679_s7 + $0x18] sm:$0xff] %v420_v14 }
 0x2ab   :  { %423 = vst [vmem:[%s679_s7 + $0x10] sm:$0xff] %v419_v15 }

</bundles_post_ra>
